<compile_context>
chip_gen: v6e
topology: v6e:2x2x1
jax: 0.10.0
libtpu: 0.0.40
codegen_flags: <defaults>
</compile_context>

<pallas_src>
import functools
import math

import jax
import jax.numpy as jnp
from jax import lax
from jax.experimental import pallas as pl
from jax.experimental.pallas import tpu as pltpu


_VMEM_LIMIT_BYTES = 64 * 1024 * 1024   # explicit scoped-VMEM cap (defaults are 16/32 MiB)
_PROJ_VMEM_BUDGET = 40 * 1024 * 1024   # planning budget for resident projection weights


def _pick_seq_block(n: int, preferred: int) -> int:
    """Largest sublane-legal (multiple of 8) divisor of n that is <= preferred.

    Falls back to the full extent n (always a legal block) only when no such divisor
    exists, so the grid always tiles the array exactly.
    """
    if n <= preferred:
        return n
    for cand in range(preferred, 7, -1):
        if n % cand == 0 and cand % 8 == 0:
            return cand
    return n


def _head_group(h: int, d_k: int, d_model: int):
    """Smallest head group whose packed lane width is legal (% 128 == 0) else all heads."""
    for g in range(1, h + 1):
        if h % g == 0 and (g * d_k) % 128 == 0:
            return g, g * d_k
    return h, d_model


def _pick_proj_tn(d_in: int, d_out: int, tq: int, n_proj: int,
                  w_itemsize: int, x_itemsize: int) -> int:
    """Output-dim tile for the projections: keep weights fully resident when they fit."""
    cands = [d_out] + [c for c in (2048, 1024, 512, 256, 128) if c < d_out and d_out % c == 0]
    for tn in cands:
        est = n_proj * (2 * d_in * tn * w_itemsize      # weight tiles (double-buffered)
                        + 2 * tq * d_in * x_itemsize    # activation tiles
                        + 2 * tq * tn * x_itemsize      # output tiles
                        + 2 * tn * 4)                   # bias tiles
        if est <= _PROJ_VMEM_BUDGET:
            return tn
    return cands[-1]


# ----------------------------- fused Q/K/V projection -----------------------------
def _qkv_proj_kernel(q_ref, k_ref, v_ref,
                     wq_ref, bq_ref, wk_ref, bk_ref, wv_ref, bv_ref,
                     qo_ref, ko_ref, vo_ref):
    def proj(x_ref, w_ref, b_ref, o_ref):
        y = jnp.dot(x_ref[...], w_ref[...], preferred_element_type=jnp.float32)
        o_ref[...] = (y + b_ref[...]).astype(o_ref.dtype)

    proj(q_ref, wq_ref, bq_ref, qo_ref)
    proj(k_ref, wk_ref, bk_ref, ko_ref)
    proj(v_ref, wv_ref, bv_ref, vo_ref)


def _qkv_projection(q, k, v, wq, bq, wk, bk, wv, bv, *, out_dtype, tq=256):
    B, S, D = q.shape
    tq = _pick_seq_block(S, tq)
    tn = _pick_proj_tn(D, D, tq, 3, wq.dtype.itemsize, q.dtype.itemsize)

    # x tiles are resident across the j (output-column) axis; weight/bias blocks are
    # constant across (b, i) and fully resident whenever tn == D.
    x_spec = pl.BlockSpec((None, tq, D), lambda b, i, j: (b, i, 0))
    w_spec = pl.BlockSpec((D, tn), lambda b, i, j: (0, j))
    b_spec = pl.BlockSpec((1, tn), lambda b, i, j: (0, j))
    o_spec = pl.BlockSpec((None, tq, tn), lambda b, i, j: (b, i, j))

    flops = 3 * 2 * B * S * D * D
    bytes_accessed = int(3 * q.size * q.dtype.itemsize
                         + 3 * D * D * wq.dtype.itemsize + 3 * D * 4
                         + 3 * B * S * D * jnp.dtype(out_dtype).itemsize)

    out_sds = jax.ShapeDtypeStruct((B, S, D), out_dtype)
    return pl.pallas_call(
        _qkv_proj_kernel,
        out_shape=(out_sds, out_sds, out_sds),
        grid=(B, S // tq, D // tn),
        in_specs=[x_spec, x_spec, x_spec,
                  w_spec, b_spec, w_spec, b_spec, w_spec, b_spec],
        out_specs=(o_spec, o_spec, o_spec),
        compiler_params=pltpu.CompilerParams(
            dimension_semantics=("parallel", "parallel", "arbitrary"),
            vmem_limit_bytes=_VMEM_LIMIT_BYTES),
        cost_estimate=pl.CostEstimate(flops=flops, transcendentals=0,
                                      bytes_accessed=bytes_accessed),
    )(q, k, v, wq, bq, wk, bk, wv, bv)


# ----------------------------- attention core -----------------------------
def _attention_kernel(q_ref, k_ref, v_ref, mask_ref, o_ref, *,
                      heads_per_blk, d_k, approx_recip):
    # q_ref/o_ref: (tq, dg) on the (B,S,D) slab; k_ref/v_ref: (S, dg) resident across
    # q-tiles; mask_ref: (tq, S) int8 (nonzero = keep). Softmax scale folded into w_q.
    q = q_ref[...]
    k = k_ref[...]
    v = v_ref[...]
    keep = mask_ref[...] != 0                       # computed once per tile
    neg_inf = jnp.float32(-1e9)

    ctx_parts = []
    for hi in range(heads_per_blk):
        sl = slice(hi * d_k, (hi + 1) * d_k)
        qh, kh, vh = q[:, sl], k[:, sl], v[:, sl]
        # Q @ K^T without materializing a transpose (contract last dims of both).
        s = lax.dot_general(qh, kh, (((1,), (1,)), ((), ())),
                            preferred_element_type=jnp.float32)     # (tq, S)
        s = jnp.where(keep, s, neg_inf)                             # in-kernel mask select
        m = jnp.max(s, axis=-1, keepdims=True)
        p = jnp.exp(s - m)                                          # f32 softmax (v5e-safe)
        l = jnp.sum(p, axis=-1, keepdims=True)
        ctx = jnp.dot(p.astype(vh.dtype), vh,
                      preferred_element_type=jnp.float32)           # (tq, d_k)
        inv = pl.reciprocal(l, approx=True) if approx_recip else 1.0 / l
        ctx_parts.append(ctx * inv)

    out = ctx_parts[0] if len(ctx_parts) == 1 else jnp.concatenate(ctx_parts, axis=-1)
    o_ref[...] = out.astype(o_ref.dtype)            # lane-dense (tq, dg) store


def _attention(q, k, v, mask_i8, *, n_heads, out_dtype, approx_recip, tq=256):
    """q, k, v: (B, S, D) slabs; mask_i8: (B, S, S) int8.  Returns (B, S, D)."""
    B, S, D = q.shape
    d_k = D // n_heads
    g, dg = _head_group(n_heads, d_k, D)
    n_grp = D // dg
    tq = _pick_seq_block(S, tq)

    flops = 4 * B * n_heads * S * S * d_k
    transcendentals = B * n_heads * S * S
    bytes_accessed = int(3 * q.size * q.dtype.itemsize + mask_i8.size
                         + B * S * D * jnp.dtype(out_dtype).itemsize)

    kernel = functools.partial(_attention_kernel, heads_per_blk=g, d_k=d_k,
                               approx_recip=approx_recip)

    qo_spec = pl.BlockSpec((None, tq, dg), lambda b, hg, qi: (b, qi, hg))
    kv_spec = pl.BlockSpec((None, S, dg), lambda b, hg, qi: (b, 0, hg))   # qi-invariant
    mk_spec = pl.BlockSpec((None, tq, S), lambda b, hg, qi: (b, qi, 0))

    return pl.pallas_call(
        kernel,
        out_shape=jax.ShapeDtypeStruct((B, S, D), out_dtype),
        grid=(B, n_grp, S // tq),
        in_specs=[qo_spec, kv_spec, kv_spec, mk_spec],
        out_specs=qo_spec,
        compiler_params=pltpu.CompilerParams(
            # qi innermost + "arbitrary" keeps the K/V blocks resident across q-tiles;
            # (b, head-group) give megacore-parallel work on v7x.
            dimension_semantics=("parallel", "parallel", "arbitrary"),
            vmem_limit_bytes=_VMEM_LIMIT_BYTES),
        cost_estimate=pl.CostEstimate(flops=flops, transcendentals=transcendentals,
                                      bytes_accessed=bytes_accessed),
    )(q, k, v, mask_i8)


# ----------------------------- output projection -----------------------------
def _out_proj_kernel(x_ref, w_ref, b_ref, o_ref):
    y = jnp.dot(x_ref[...], w_ref[...], preferred_element_type=jnp.float32)
    o_ref[...] = (y + b_ref[...]).astype(o_ref.dtype)


def _out_projection(x, w, b, *, out_dtype, tq=256):
    B, S, D = x.shape
    tq = _pick_seq_block(S, tq)
    tn = _pick_proj_tn(D, D, tq, 1, w.dtype.itemsize, x.dtype.itemsize)

    flops = 2 * B * S * D * D
    bytes_accessed = int(x.size * x.dtype.itemsize + w.size * w.dtype.itemsize
                         + b.size * b.dtype.itemsize
                         + B * S * D * jnp.dtype(out_dtype).itemsize)

    return pl.pallas_call(
        _out_proj_kernel,
        out_shape=jax.ShapeDtypeStruct((B, S, D), out_dtype),
        grid=(B, S // tq, D // tn),
        in_specs=[pl.BlockSpec((None, tq, D), lambda b2, i, j: (b2, i, 0)),
                  pl.BlockSpec((D, tn), lambda b2, i, j: (0, j)),
                  pl.BlockSpec((1, tn), lambda b2, i, j: (0, j))],
        out_specs=pl.BlockSpec((None, tq, tn), lambda b2, i, j: (b2, i, j)),
        compiler_params=pltpu.CompilerParams(
            dimension_semantics=("parallel", "parallel", "arbitrary"),
            vmem_limit_bytes=_VMEM_LIMIT_BYTES),
        cost_estimate=pl.CostEstimate(flops=flops, transcendentals=0,
                                      bytes_accessed=bytes_accessed),
    )(x, w, b)


# ----------------------------- full module forward -----------------------------
def multi_head_attention(q, k, v, mask, params, h, *, compute_dtype=jnp.bfloat16):
    """Forward of MultiHeadAttentionBlock (dropout = identity).

    compute_dtype is the MXU-input dtype (bf16 default for v5e/v6e/v7x MXU peak);
    all accumulation and softmax/elementwise math is f32.
    """
    wq, bq, wk, bk, wv, bv, wo, bo = params
    B, S, D = q.shape
    assert D % h == 0, "d_model must be divisible by h"
    d_k = D // h
    cdt = jnp.dtype(compute_dtype)
    scale = 1.0 / math.sqrt(d_k)

    # Fold the softmax scale into the Q projection (one-time D*D wrapper cost).
    wq_s = (wq * scale).astype(cdt)
    bq_s = (bq * scale).astype(jnp.float32)

    # 1) Q/K/V projections in a single pallas_call; outputs stay in (B, S, D) layout.
    Q, K, V = _qkv_projection(
        q.astype(cdt), k.astype(cdt), v.astype(cdt),
        wq_s, bq_s,
        wk.astype(cdt), bk.astype(jnp.float32),
        wv.astype(cdt), bv.astype(jnp.float32),
        out_dtype=cdt)

    # 2) int8 mask streamed as-is; masking select happens in-kernel (no f32 bias tensor).
    mask_i8 = (mask != 0).astype(jnp.int8)

    # 3) Attention over head groups directly on the (B, S, D) slab: no head split/merge
    #    transposes; K/V resident per (batch, head-group); output already merged.
    ctx = _attention(Q, K, V, mask_i8, n_heads=h, out_dtype=cdt,
                     approx_recip=(cdt != jnp.dtype(jnp.float32)))

    # 4) Output projection.
    return _out_projection(ctx, wo.astype(cdt), bo.astype(jnp.float32),
                           out_dtype=jnp.float32)


# ----------------------------- pure-JAX reference -----------------------------
def reference_mha(q, k, v, mask, params, h):
    """Pure-JAX reference matching the PyTorch forward (dropout = identity)."""
    wq, bq, wk, bk, wv, bv, wo, bo = params
    B, S, D = q.shape
    d_k = D // h

    def proj(x, w, b):
        return x @ w + b

    Q = proj(q, wq, bq).reshape(B, S, h, d_k).transpose(0, 2, 1, 3)
    K = proj(k, wk, bk).reshape(B, S, h, d_k).transpose(0, 2, 1, 3)
    V = proj(v, wv, bv).reshape(B, S, h, d_k).transpose(0, 2, 1, 3)

    scores = jnp.einsum("bhqd,bhkd->bhqk", Q, K) / math.sqrt(d_k)
    scores = jnp.where(mask[:, None, :, :] == 0, -1e9, scores)
    attn = jax.nn.softmax(scores, axis=-1)
    x = jnp.einsum("bhqk,bhkd->bhqd", attn, V)
    x = x.transpose(0, 2, 1, 3).reshape(B, S, D)
    return x @ wo + bo


if __name__ == "__main__":
    # Small shapes consistent with the module: batch=2, seq=8, d_model=32, h=4 heads.
    B, S, D, H = 2, 8, 32, 4

    key = jax.random.PRNGKey(0)
    keys = jax.random.split(key, 11)

    q = jax.random.normal(keys[0], (B, S, D), dtype=jnp.float32)
    k = jax.random.normal(keys[1], (B, S, D), dtype=jnp.float32)
    v = jax.random.normal(keys[2], (B, S, D), dtype=jnp.float32)

    # causal mask (1 = attend, 0 = masked)
    mask = jnp.broadcast_to(jnp.tril(jnp.ones((S, S), dtype=jnp.int32)), (B, S, S))

    def make_linear(kw, kb):
        bound = 1.0 / math.sqrt(D)
        w = jax.random.uniform(kw, (D, D), minval=-bound, maxval=bound, dtype=jnp.float32)
        b = jax.random.uniform(kb, (1, D), minval=-bound, maxval=bound, dtype=jnp.float32)
        return w, b

    wq, bq = make_linear(keys[3], keys[4])
    wk, bk = make_linear(keys[5], keys[6])
    wv, bv = make_linear(keys[7], keys[8])
    wo, bo = make_linear(keys[9], keys[10])
    params = (wq, bq, wk, bk, wv, bv, wo, bo)

    ref = reference_mha(q, k, v, mask, params, H)

    # f32 compute path (tight check; exact division is used on this path).
    out_f32 = jax.block_until_ready(
        multi_head_attention(q, k, v, mask, params, H, compute_dtype=jnp.float32))
    assert out_f32.shape == (B, S, D)
    assert jnp.allclose(out_f32, ref, atol=2e-3, rtol=2e-3), "f32 Pallas output mismatch"

    # Default bf16 MXU-input path (f32 accumulation / softmax) — loose check.
    out_bf16 = jax.block_until_ready(
        multi_head_attention(q, k, v, mask, params, H))
    assert out_bf16.shape == (B, S, D)
    assert bool(jnp.all(jnp.isfinite(out_bf16)))
    assert jnp.allclose(out_bf16, ref, atol=1e-1, rtol=1e-1), "bf16 Pallas output mismatch"

    print("KERNEL_OK")
</pallas_src>

<mosaic_0001>
module attributes {stable_mosaic.version = 11 : i64} {
  func.func @_qkv_proj_kernel(%arg0: i32, %arg1: i32, %arg2: i32, %arg3: memref<1x8x32xf32, #tpu.memory_space<vmem>>, %arg4: memref<1x8x32xf32, #tpu.memory_space<vmem>>, %arg5: memref<1x8x32xf32, #tpu.memory_space<vmem>>, %arg6: memref<32x32xf32, #tpu.memory_space<vmem>>, %arg7: memref<1x32xf32, #tpu.memory_space<vmem>>, %arg8: memref<32x32xf32, #tpu.memory_space<vmem>>, %arg9: memref<1x32xf32, #tpu.memory_space<vmem>>, %arg10: memref<32x32xf32, #tpu.memory_space<vmem>>, %arg11: memref<1x32xf32, #tpu.memory_space<vmem>>, %arg12: memref<1x8x32xf32, #tpu.memory_space<vmem>>, %arg13: memref<1x8x32xf32, #tpu.memory_space<vmem>>, %arg14: memref<1x8x32xf32, #tpu.memory_space<vmem>>) attributes {dimension_semantics = [#tpu.dimension_semantics<parallel>, #tpu.dimension_semantics<parallel>, #tpu.dimension_semantics<arbitrary>], iteration_bounds = array<i64: 2, 1, 1>, scalar_prefetch = 0 : i64, scratch_operands = 0 : i64, tpu.core_type = #tpu.core_type<tc>, window_params = [{transform_indices = @transform_0, window_bounds = array<i64: 1, 8, 32>}, {transform_indices = @transform_1, window_bounds = array<i64: 1, 8, 32>}, {transform_indices = @transform_2, window_bounds = array<i64: 1, 8, 32>}, {transform_indices = @transform_3, window_bounds = array<i64: 32, 32>}, {transform_indices = @transform_4, window_bounds = array<i64: 1, 32>}, {transform_indices = @transform_5, window_bounds = array<i64: 32, 32>}, {transform_indices = @transform_6, window_bounds = array<i64: 1, 32>}, {transform_indices = @transform_7, window_bounds = array<i64: 32, 32>}, {transform_indices = @transform_8, window_bounds = array<i64: 1, 32>}, {transform_indices = @transform_9, window_bounds = array<i64: 1, 8, 32>}, {transform_indices = @transform_10, window_bounds = array<i64: 1, 8, 32>}, {transform_indices = @transform_11, window_bounds = array<i64: 1, 8, 32>}]} {
    %c0 = arith.constant 0 : index
    %c0_0 = arith.constant 0 : index
    %c0_1 = arith.constant 0 : index
    %0 = vector.load %arg3[%c0, %c0_0, %c0_1] : memref<1x8x32xf32, #tpu.memory_space<vmem>>, vector<1x8x32xf32>
    %1 = vector.shape_cast %0 : vector<1x8x32xf32> to vector<8x32xf32>
    %c0_2 = arith.constant 0 : index
    %c0_3 = arith.constant 0 : index
    %2 = vector.load %arg6[%c0_2, %c0_3] : memref<32x32xf32, #tpu.memory_space<vmem>>, vector<32x32xf32>
    %cst = arith.constant dense<0.000000e+00> : vector<8x32xf32>
    %3 = tpu.matmul %1, %2, %cst {dimension_numbers = #tpu.dot_dimension_numbers<[1], [0], [0], [1], [0, 0, 1, 1], [], []>} : vector<8x32xf32>, vector<32x32xf32>, vector<8x32xf32> -> vector<8x32xf32>
    %c0_4 = arith.constant 0 : index
    %c0_5 = arith.constant 0 : index
    %4 = vector.load %arg7[%c0_4, %c0_5] : memref<1x32xf32, #tpu.memory_space<vmem>>, vector<1x32xf32>
    %5 = vector.broadcast %4 : vector<1x32xf32> to vector<8x32xf32>
    %6 = arith.addf %3, %5 : vector<8x32xf32>
    %c0_6 = arith.constant 0 : index
    %c0_7 = arith.constant 0 : index
    %c0_8 = arith.constant 0 : index
    %7 = vector.load %arg12[%c0_6, %c0_7, %c0_8] : memref<1x8x32xf32, #tpu.memory_space<vmem>>, vector<1x8x32xf32>
    %8 = vector.shape_cast %7 : vector<1x8x32xf32> to vector<8x32xf32>
    %9 = vector.shape_cast %6 : vector<8x32xf32> to vector<1x8x32xf32>
    tpu.vector_store %arg12[%c0_6, %c0_7, %c0_8], %9 {strides = array<i32>} : memref<1x8x32xf32, #tpu.memory_space<vmem>>, vector<1x8x32xf32>,
    %c0_9 = arith.constant 0 : index
    %c0_10 = arith.constant 0 : index
    %c0_11 = arith.constant 0 : index
    %10 = vector.load %arg4[%c0_9, %c0_10, %c0_11] : memref<1x8x32xf32, #tpu.memory_space<vmem>>, vector<1x8x32xf32>
    %11 = vector.shape_cast %10 : vector<1x8x32xf32> to vector<8x32xf32>
    %c0_12 = arith.constant 0 : index
    %c0_13 = arith.constant 0 : index
    %12 = vector.load %arg8[%c0_12, %c0_13] : memref<32x32xf32, #tpu.memory_space<vmem>>, vector<32x32xf32>
    %cst_14 = arith.constant dense<0.000000e+00> : vector<8x32xf32>
    %13 = tpu.matmul %11, %12, %cst_14 {dimension_numbers = #tpu.dot_dimension_numbers<[1], [0], [0], [1], [0, 0, 1, 1], [], []>} : vector<8x32xf32>, vector<32x32xf32>, vector<8x32xf32> -> vector<8x32xf32>
    %c0_15 = arith.constant 0 : index
    %c0_16 = arith.constant 0 : index
    %14 = vector.load %arg9[%c0_15, %c0_16] : memref<1x32xf32, #tpu.memory_space<vmem>>, vector<1x32xf32>
    %15 = vector.broadcast %14 : vector<1x32xf32> to vector<8x32xf32>
    %16 = arith.addf %13, %15 : vector<8x32xf32>
    %c0_17 = arith.constant 0 : index
    %c0_18 = arith.constant 0 : index
    %c0_19 = arith.constant 0 : index
    %17 = vector.load %arg13[%c0_17, %c0_18, %c0_19] : memref<1x8x32xf32, #tpu.memory_space<vmem>>, vector<1x8x32xf32>
    %18 = vector.shape_cast %17 : vector<1x8x32xf32> to vector<8x32xf32>
    %19 = vector.shape_cast %16 : vector<8x32xf32> to vector<1x8x32xf32>
    tpu.vector_store %arg13[%c0_17, %c0_18, %c0_19], %19 {strides = array<i32>} : memref<1x8x32xf32, #tpu.memory_space<vmem>>, vector<1x8x32xf32>,
    %c0_20 = arith.constant 0 : index
    %c0_21 = arith.constant 0 : index
    %c0_22 = arith.constant 0 : index
    %20 = vector.load %arg5[%c0_20, %c0_21, %c0_22] : memref<1x8x32xf32, #tpu.memory_space<vmem>>, vector<1x8x32xf32>
    %21 = vector.shape_cast %20 : vector<1x8x32xf32> to vector<8x32xf32>
    %c0_23 = arith.constant 0 : index
    %c0_24 = arith.constant 0 : index
    %22 = vector.load %arg10[%c0_23, %c0_24] : memref<32x32xf32, #tpu.memory_space<vmem>>, vector<32x32xf32>
    %cst_25 = arith.constant dense<0.000000e+00> : vector<8x32xf32>
    %23 = tpu.matmul %21, %22, %cst_25 {dimension_numbers = #tpu.dot_dimension_numbers<[1], [0], [0], [1], [0, 0, 1, 1], [], []>} : vector<8x32xf32>, vector<32x32xf32>, vector<8x32xf32> -> vector<8x32xf32>
    %c0_26 = arith.constant 0 : index
    %c0_27 = arith.constant 0 : index
    %24 = vector.load %arg11[%c0_26, %c0_27] : memref<1x32xf32, #tpu.memory_space<vmem>>, vector<1x32xf32>
    %25 = vector.broadcast %24 : vector<1x32xf32> to vector<8x32xf32>
    %26 = arith.addf %23, %25 : vector<8x32xf32>
    %c0_28 = arith.constant 0 : index
    %c0_29 = arith.constant 0 : index
    %c0_30 = arith.constant 0 : index
    %27 = vector.load %arg14[%c0_28, %c0_29, %c0_30] : memref<1x8x32xf32, #tpu.memory_space<vmem>>, vector<1x8x32xf32>
    %28 = vector.shape_cast %27 : vector<1x8x32xf32> to vector<8x32xf32>
    %29 = vector.shape_cast %26 : vector<8x32xf32> to vector<1x8x32xf32>
    tpu.vector_store %arg14[%c0_28, %c0_29, %c0_30], %29 {strides = array<i32>} : memref<1x8x32xf32, #tpu.memory_space<vmem>>, vector<1x8x32xf32>,
    return
  }
  func.func @transform_0(%arg0: i32, %arg1: i32, %arg2: i32) -> (i32, i32, i32) {
    %c0_i32 = arith.constant 0 : i32
    %c0_i32_0 = arith.constant 0 : i32
    return %arg0, %arg1, %c0_i32 : i32, i32, i32
  }
  func.func @transform_1(%arg0: i32, %arg1: i32, %arg2: i32) -> (i32, i32, i32) {
    %c0_i32 = arith.constant 0 : i32
    %c0_i32_0 = arith.constant 0 : i32
    return %arg0, %arg1, %c0_i32 : i32, i32, i32
  }
  func.func @transform_2(%arg0: i32, %arg1: i32, %arg2: i32) -> (i32, i32, i32) {
    %c0_i32 = arith.constant 0 : i32
    %c0_i32_0 = arith.constant 0 : i32
    return %arg0, %arg1, %c0_i32 : i32, i32, i32
  }
  func.func @transform_3(%arg0: i32, %arg1: i32, %arg2: i32) -> (i32, i32) {
    %c0_i32 = arith.constant 0 : i32
    %c0_i32_0 = arith.constant 0 : i32
    return %c0_i32, %arg2 : i32, i32
  }
  func.func @transform_4(%arg0: i32, %arg1: i32, %arg2: i32) -> (i32, i32) {
    %c0_i32 = arith.constant 0 : i32
    %c0_i32_0 = arith.constant 0 : i32
    return %c0_i32, %arg2 : i32, i32
  }
  func.func @transform_5(%arg0: i32, %arg1: i32, %arg2: i32) -> (i32, i32) {
    %c0_i32 = arith.constant 0 : i32
    %c0_i32_0 = arith.constant 0 : i32
    return %c0_i32, %arg2 : i32, i32
  }
  func.func @transform_6(%arg0: i32, %arg1: i32, %arg2: i32) -> (i32, i32) {
    %c0_i32 = arith.constant 0 : i32
    %c0_i32_0 = arith.constant 0 : i32
    return %c0_i32, %arg2 : i32, i32
  }
  func.func @transform_7(%arg0: i32, %arg1: i32, %arg2: i32) -> (i32, i32) {
    %c0_i32 = arith.constant 0 : i32
    %c0_i32_0 = arith.constant 0 : i32
    return %c0_i32, %arg2 : i32, i32
  }
  func.func @transform_8(%arg0: i32, %arg1: i32, %arg2: i32) -> (i32, i32) {
    %c0_i32 = arith.constant 0 : i32
    %c0_i32_0 = arith.constant 0 : i32
    return %c0_i32, %arg2 : i32, i32
  }
  func.func @transform_9(%arg0: i32, %arg1: i32, %arg2: i32) -> (i32, i32, i32) {
    %c0_i32 = arith.constant 0 : i32
    return %arg0, %arg1, %arg2 : i32, i32, i32
  }
  func.func @transform_10(%arg0: i32, %arg1: i32, %arg2: i32) -> (i32, i32, i32) {
    %c0_i32 = arith.constant 0 : i32
    return %arg0, %arg1, %arg2 : i32, i32, i32
  }
  func.func @transform_11(%arg0: i32, %arg1: i32, %arg2: i32) -> (i32, i32, i32) {
    %c0_i32 = arith.constant 0 : i32
    return %arg0, %arg1, %arg2 : i32, i32, i32
  }
}

</mosaic_0001>

<bundles_post_ra>
// kernel: tpu_custom_call.1
= control target key start
LH: loop header
LB: loop body
LE: loop exit
PB: predicated region body
PF: predicated region fallthrough
CT: control target
= control target key end

     0   :  { %s2154_s0 = inlined_call_operand.hbm [shape: f32[2,8,32], index: 0, kind: input, shape index: {}]   ;;  %s2155_s1 = inlined_call_operand.hbm [shape: f32[2,8,32], index: 1, kind: input, shape index: {}]   ;;  %s2156_s2 = inlined_call_operand.hbm [shape: f32[2,8,32], index: 2, kind: input, shape index: {}]   ;;  %s2157_s3 = inlined_call_operand.hbm [shape: f32[32,32], index: 3, kind: input, shape index: {}]   ;;  %s2158_s4 = inlined_call_operand.vmem [shape: f32[1,32], index: 4, kind: input, shape index: {}]   ;;  %s2159_s5 = inlined_call_operand.hbm [shape: f32[32,32], index: 5, kind: input, shape index: {}]   ;;  %s2160_s6 = inlined_call_operand.vmem [shape: f32[1,32], index: 6, kind: input, shape index: {}]   ;;  %s2161_s7 = inlined_call_operand.hbm [shape: f32[32,32], index: 7, kind: input, shape index: {}]   ;;  %s2162_s8 = inlined_call_operand.vmem [shape: f32[1,32], index: 8, kind: input, shape index: {}]   ;;  %s2163_s9 = inlined_call_operand.hbm [shape: f32[2,8,32], index: 9, kind: output, shape index: {0}]   ;;  %s2164_s10 = inlined_call_operand.hbm [shape: f32[2,8,32], index: 10, kind: output, shape index: {1}]   ;;  %s2165_s11 = inlined_call_operand.hbm [shape: f32[2,8,32], index: 11, kind: output, shape index: {2}]  }
   0x1   :  { %2186 = sst [smem:[#allocation29_spill]] %s2155_s1 }
   0x2   :  { %2187 = sst [smem:[#allocation30_spill]] %s2157_s3 }
   0x3   :  { %2188 = sst [smem:[#allocation31_spill]] %s2159_s5 }
   0x4   :  { %2189 = sst [smem:[#allocation32_spill]] %s2162_s8 }
   0x5   :  { %2190 = sst [smem:[#allocation33_spill]] %s2164_s10 }
   0x6   :  { %2191 = sst [smem:[#allocation34_spill]] %s2165_s11 }
   0x7   :  { %17 = vsyncpa [#allocation3], 0 }
   0x8   :  { %19 = vsyncpa [#allocation3 + $0x1], 0 }
   0x9   :  { %20 = vsyncpa [#allocation6], 0 }
   0xa   :  { %22 = vsyncpa [#allocation6 + $0x1], 0 }
   0xb   :  { %23 = vsyncpa [#allocation9], 0 }
   0xc   :  { %24 = vsyncpa [#allocation12], 0 }
   0xd   :  { %25 = vsyncpa [#allocation4], 0 }
   0xe   :  { %27 = vsyncpa [#allocation4 + $0x1], 0 }
   0xf   :  { %28 = vsyncpa [#allocation15], 0 }
  0x10   :  { %30 = vsyncpa [#allocation15 + $0x1], 0  ;;  %s1808_s17 = smov 0   ;;  %s1810_s18 = smov 0  }
  0x11   :  { %s1812_s19 = smov 0   ;;  %s1814_s20 = smov 0  }
  0x12   :  { %s1816_s21 = smov 0   ;;  %s1818_s22 = smov 0  }
  0x13 LB: > { %2192 = sst [smem:[#allocation23_spill]] %s1713_s17  ;;  %s1839_s23 = sadd.s32 4294967295, %s1733_s22   ;;  %s1733_s22 = sphi %s1818_s22, %s36_s22   ;;  %s1729_s21 = sphi %s1816_s21, %s2234_s21   ;;  %s1725_s20 = sphi %s1814_s20, %s2233_s20   ;;  %s1721_s19 = sphi %s1812_s19, %s2237_s19   ;;  %s1717_s18 = sphi %s1810_s18, %s2236_s18   ;;  %s1713_s17 = sphi %s1808_s17, %s2235_s17  }
  0x14   : > { %2193 = sst [smem:[#allocation24_spill]] %s1729_s21  ;;  %s2166_s24 = sadd.s32 4294967294, %s1733_s22  }
  0x15   : > { %2194 = sst [smem:[#allocation25_spill]] %s1733_s22  ;;  %p77_p0 = scmp.ne.s32.totalorder %s1717_s18, %s1713_s17 }
  0x16   : > { %p2180_p1 = scmp.eq.s32.totalorder %s1839_s23, 0  ;;  %p323_p3 = scmp.eq.s32.totalorder %s2166_s24, 1 }
  0x17   : > { %p1220_p5 = scmp.ge.s32.totalorder %s1733_s22, 1  ;;  %p390_p7 = scmp.lt.s32.totalorder %s1733_s22, 3 }
  0x18   : > { %p1850_p4 = por %p2180_p1, %p77_p0  ;;  %p1855_p6 = por %p323_p3, %p77_p0 }
  0x19   : > { %p1860_p8 = pnand %p1220_p5, %p390_p7  ;;  %s1735_s28 = smov [#allocation8]  }
  0x1a   : > { %s2195_s25 = scalar_select %p1850_p4, 1, 0 }
  0x1b   : > { %s2196_s26 = scalar_select %p1855_p6, 1, 0 }
  0x1c   : > { %s2198_s27 = scalar_select %p1860_p8, 1, 0 }
  0x1d   : > { %2197 = sst [smem:[#allocation26_spill]] %s2196_s26  ;;  %s404_s29 = sshll.u32 %s1735_s28, 4  ;;  %s405_s29 = int_to_ptr.vmem [resolvable:$true] %s404_s29 }
  0x1e   : > { %p1330_p9 = pneg %p1860_p8  ;;  %s55_s12 = sadd.s32 1, %s1729_s21 }
  0x1f   : > { %s1434_s13 = scalar_lea.vmem %s405_s29, 512  ;;  %p1442_p5 = scmp.lt.s32.totalorder %s405_s29, %s405_s29 }
  0x20   : > { %p1869_p11 = pnand %p1330_p9, %p2180_p1  ;;  %p1435_p13 = scmp.ne.s32.totalorder %s405_s29, %s1434_s13 }
  0x21   : > { %p1443_p7 = scmp.lt.s32.totalorder %s1434_s13, %s1434_s13 }
  0x22   : > { %p2181_p12 = pneg %p1869_p11 }
  0x23   : > { %p1444_p2 = por %p1443_p7, %p1442_p5 }
  0x24   : > { %p1437_p0 = pnand %p1435_p13, %p2181_p12 }
  0x26   : > { %p1438_p3 = pneg %p1437_p0 }
  0x28   : > { %p1445_p10 = pnand %p1444_p2, %p1438_p3 }
  0x2a   : > { %1448 = shalt.err (!%p1445_p10)
}
  0x2b   : > { %s2169_s14 = smov 128   ;;  %s2171_s15 = smov 8  }
  0x2c   : > { %s2200_s3 = sld [smem:[#allocation30_spill]]  ;;  %p57_p2 = scmp.ge.s32.totalorder %s55_s12, 2 }
  0x2d   : > { %s64_s13 = sadd.s32 1, %s1721_s19  ;;  %p71_p9 = scmp.ne.s32.totalorder %s1721_s19, %s1717_s18 }
  0x2e   : > { %p72_p10 = scmp.eq.s32.totalorder %s1733_s22, 0  ;;  %s2239_s12 = smov (%p57_p2, %s55_s12), 0 }
  0x2f   : > { %2201 = sst [smem:[#allocation27_spill]] %s2239_s12  ;;  %p2202_p0 = scmp.eq.s32.totalorder %s1839_s23, 1 }
  0x30   : > { %p73_p13 = por %p72_p10, %p71_p9  ;;  %s59_s26 = ssub.s32 %s1729_s21, %s2239_s12 }
  0x31   : > { %p1895_p3 = por %p2202_p0, %p71_p9  ;;  %p1363_p5 = scmp.lt.s32.totalorder %s1733_s22, 2 }
  0x32   : > { %1333 = dma.hbm_to_vmem [thread:$0]  (!%p1869_p11), %s2200_s3, 512, %s405_s29, [#allocation9], %s2169_s14, %s2169_s14, %s2171_s15  }
  0x33   : > { %s2203_s24 = scalar_select %p1895_p3, 1, 0 }
  0x34   : > { %p62_p7 = scmp.eq.s32.totalorder %s59_s26, 0  ;;  %s2175_s17 = sand.u32 1, %s1721_s19  }
  0x35   : > { %s1905_s29 = sshll.u32 %s2175_s17, 3  ;;  %s1908_s16 = sshll.u32 %s1729_s21, 7 }
  0x36   : > { %s1911_s28 = scalar_select %p62_p7, %s1721_s19, %s64_s13  }
  0x37   : > { %p1913_p2 = pnand %p1363_p5, %p73_p13  ;;  %s485_s15 = sand.u32 1, %s1733_s22  }
  0x38   : > { %2204 = sst [smem:[#allocation28_spill]] %s1911_s28  ;;  %s489_s11 = scalar_lea.vmem [#allocation5], %s1905_s29 }
  0x39   : > { %s2206_s1 = sld [smem:[#allocation29_spill]]  ;;  %s497_s17 = sshll.u32 %s489_s11, 4  ;;  %s498_s17 = int_to_ptr.vmem [resolvable:$true] %s497_s17 }
  0x3a   : > { %s1738_s8 = smov [#allocation10]   ;;  %s1923_s10 = scalar_lea.sflag [#allocation6], %s485_s15 }
  0x3b   : > { %s425_s21 = sshll.u32 %s1738_s8, 4  ;;  %p2182_p9 = pneg %p1913_p2  ;;  %s426_s21 = int_to_ptr.vmem [resolvable:$true] %s425_s21 }
  0x3c   : > { %s1462_s13 = scalar_lea.vmem %s498_s17, 128  ;;  %s1739_s28 = smov [#allocation5]  }
  0x3d   : > { %p1463_p10 = scmp.ne.s32.totalorder %s498_s17, %s1462_s13  ;;  %s1467_s22 = sshll.u32 %s1739_s28, 4  ;;  %s1468_s22 = int_to_ptr.vmem [resolvable:$false] %s1467_s22 }
  0x3e   : > { %s1469_s3 = scalar_lea.vmem %s1468_s22, 256  ;;  %p1470_p5 = scmp.lt.s32.totalorder %s498_s17, %s1468_s22 }
  0x3f   : > { %s495_s26 = scalar_lea.hbm %s2206_s1, %s1908_s16  ;;  %p1465_p13 = pnand %p1463_p10, %p2182_p9 }
  0x40   : > { %p1471_p7 = scmp.lt.s32.totalorder %s1469_s3, %s1462_s13 }
  0x41   : > { %p1466_p0 = pneg %p1465_p13 }
  0x42   : > { %p1472_p1 = por %p1471_p7, %p1470_p5 }
  0x44   : > { %p1473_p12 = pnand %p1472_p1, %p1466_p0 }
  0x46   : > { %1476 = shalt.err (!%p1473_p12)
}
  0x47   : > { %1346 = dma.hbm_to_vmem [thread:$0]  (!%p1913_p2), %s495_s26, 128, %s498_s17, %s1923_s10  }
  0x48   : > { %s1488_s8 = scalar_lea.vmem %s426_s21, 512  ;;  %p2207_p10 = pneg %p1869_p11 }
  0x49   : > { %p1489_p6 = scmp.ne.s32.totalorder %s426_s21, %s1488_s8  ;;  %p1496_p3 = scmp.lt.s32.totalorder %s426_s21, %s426_s21 }
  0x4a   : > { %p1497_p4 = scmp.lt.s32.totalorder %s1488_s8, %s1488_s8 }
  0x4b   : > { %p1491_p13 = pnand %p1489_p6, %p2207_p10 }
  0x4c   : > { %p1498_p8 = por %p1497_p4, %p1496_p3 }
  0x4d   : > { %p1492_p9 = pneg %p1491_p13 }
  0x4f   : > { %p1499_p5 = pnand %p1498_p8, %p1492_p9 }
  0x51   : > { %1502 = shalt.err (!%p1499_p5)
}
  0x52   : > { %s2208_s11 = smov 8   ;;  %s2209_s22 = smov 128  }
  0x53   : > { %s2210_s5 = sld [smem:[#allocation31_spill]]  ;;  %s1740_s17 = smov [#allocation11]  }
  0x54   : > { %s446_s28 = sshll.u32 %s1740_s17, 4  ;;  %p2211_p6 = pmov %p2207_p10  ;;  %s447_s28 = int_to_ptr.vmem [resolvable:$true] %s446_s28 }
  0x55   : > { %s1514_s26 = scalar_lea.vmem %s447_s28, 512  ;;  %p1522_p12 = scmp.lt.s32.totalorder %s447_s28, %s447_s28 }
  0x56   : > { %p1515_p1 = scmp.ne.s32.totalorder %s447_s28, %s1514_s26  ;;  %p1523_p3 = scmp.lt.s32.totalorder %s1514_s26, %s1514_s26 }
  0x58   : > { %p1517_p4 = pnand %p1515_p1, %p2211_p6  ;;  %p1524_p9 = por %p1523_p3, %p1522_p12 }
  0x59   : > { %1336 = dma.hbm_to_vmem [thread:$0]  (!%p1869_p11), %s2210_s5, 512, %s426_s21, [#allocation9], %s2209_s22, %s2209_s22, %s2208_s11  }
  0x5a   : > { %p1518_p8 = pneg %p1517_p4 }
  0x5c   : > { %p1525_p0 = pnand %p1524_p9, %p1518_p8 }
  0x5e   : > { %1528 = shalt.err (!%p1525_p0)
}
  0x5f   : > { %1339 = dma.hbm_to_vmem [thread:$0]  (!%p1869_p11), %s2161_s7, 512, %s447_s28, [#allocation12], %s2209_s22, %s2209_s22, %s2208_s11  }
  0x60   : > { %s476_s12 = scalar_lea.hbm %s2154_s0, %s1908_s16  ;;  %s470_s15 = scalar_lea.vmem [#allocation2], %s1905_s29 }
  0x61   : > { %s478_s17 = sshll.u32 %s470_s15, 4  ;;  %s2212_s26 = sand.u32 1, %s1721_s19   ;;  %s479_s17 = int_to_ptr.vmem [resolvable:$true] %s478_s17 }
  0x62   : > { %s467_s30 = scalar_lea.sflag [#allocation3], %s2212_s26  ;;  %s1542_s1 = scalar_lea.vmem %s479_s17, 128 }
  0x63   : > { %p1543_p7 = scmp.ne.s32.totalorder %s479_s17, %s1542_s1  ;;  %p2213_p10 = pneg %p1913_p2 }
  0x64   : > { %s1741_s21 = smov [#allocation2]  }
  0x65   : > { %p1545_p13 = pnand %p1543_p7, %p2213_p10  ;;  %s1547_s13 = sshll.u32 %s1741_s21, 4  ;;  %s1548_s13 = int_to_ptr.vmem [resolvable:$false] %s1547_s13 }
  0x66   : > { %s1549_s5 = scalar_lea.vmem %s1548_s13, 256  ;;  %p1550_p11 = scmp.lt.s32.totalorder %s479_s17, %s1548_s13 }
  0x67   : > { %p1546_p5 = pneg %p1545_p13  ;;  %p1551_p1 = scmp.lt.s32.totalorder %s1549_s5, %s1542_s1 }
  0x69   : > { %p1552_p6 = por %p1551_p1, %p1550_p11 }
  0x6b   : > { %p1553_p4 = pnand %p1552_p6, %p1546_p5 }
  0x6d   : > { %1556 = shalt.err (!%p1553_p4)
}
  0x6e   : > { %1343 = dma.hbm_to_vmem [thread:$0]  (!%p1913_p2), %s476_s12, 128, %s479_s17, %s467_s30  }
  0x6f   : > { %s514_s28 = scalar_lea.hbm %s2156_s2, %s1908_s16  ;;  %s508_s3 = scalar_lea.vmem [#allocation7], %s1905_s29 }
  0x70   : > { %s516_s8 = sshll.u32 %s508_s3, 4  ;;  %p2214_p12 = pmov %p2213_p10  ;;  %s517_s8 = int_to_ptr.vmem [resolvable:$true] %s516_s8 }
  0x71   : > { %s1570_s15 = scalar_lea.vmem %s517_s8, 128  ;;  %s1742_s1 = smov [#allocation7]  }
  0x72   : > { %p1571_p8 = scmp.ne.s32.totalorder %s517_s8, %s1570_s15  ;;  %s1575_s5 = sshll.u32 %s1742_s1, 4  ;;  %s1576_s5 = int_to_ptr.vmem [resolvable:$false] %s1575_s5 }
  0x73   : > { %s1577_s26 = scalar_lea.vmem %s1576_s5, 256  ;;  %p1578_p0 = scmp.lt.s32.totalorder %s517_s8, %s1576_s5 }
  0x74   : > { %p1573_p3 = pnand %p1571_p8, %p2214_p12  ;;  %p1579_p7 = scmp.lt.s32.totalorder %s1577_s26, %s1570_s15 }
  0x76   : > { %p1574_p9 = pneg %p1573_p3  ;;  %p1580_p10 = por %p1579_p7, %p1578_p0 }
  0x78   : > { %p1581_p13 = pnand %p1580_p10, %p1574_p9 }
  0x7a   : > { %1584 = shalt.err (!%p1581_p13)
}
  0x7b   : > { %1349 = dma.hbm_to_vmem [thread:$0]  (!%p1913_p2), %s514_s28, 128, %s517_s8, %s1923_s10  }
  0x7c   : > { %p2215_p5 = scmp.ne.s32.totalorder %s2198_s27, 0 }
  0x7d   : > { %s1981_s29 = sand.u32 (!%p2215_p5), 1, %s1717_s18   ;;  %p2216_p11 = scmp.ne.s32.totalorder (!%p2215_p5), %s2195_s25, 0 }
  0x7e   : > { %525 = sbr.rel (%p2215_p5) target bundleno = 405 (0x195), region = 56  ;;  %s1984_s16 = sshll.u32 (!%p2215_p5), %s1981_s29, 3 }
  0x7f   : > { %s528_s12 = scalar_lea.sflag (!%p2215_p5), [#allocation3], %s1981_s29  ;;  %s531_s17 = scalar_lea.vmem (!%p2215_p5), [#allocation2], %s1984_s16 }
  0x83   : > { %1688 = dma.done.wait (%p2216_p11), %s528_s12, 128  }
  0x84   : > { %1690 = vsyncadd (%p2216_p11), %s528_s12, 4294967168  ;;  %s536_s10 = sand.u32 1, %s1839_s23   ;;  %s540_s14 = scalar_lea.vmem [#allocation5], %s1984_s16 }
  0x85   : > { %s537_s27 = scalar_lea.sflag [#allocation6], %s536_s10 }
  0x86   : > { %1692 = dma.done.wait (%p2216_p11), %s537_s27, 256  }
  0x87   : > { %1694 = vsyncadd (%p2216_p11), %s537_s27, 4294967040  ;;  %s549_s30 = scalar_lea.vmem [#allocation7], %s1984_s16  ;;  %p2217_p2 = scmp.eq.s32.totalorder %s1839_s23, 0 }
  0x89   : > { %1696 = dma.done.wait (%p2217_p2), [#allocation9], 1024   ;;  %p2218_p1 = pmov %p2217_p2 }
  0x8b   : > { %1698 = vsyncadd (%p2218_p1), [#allocation9], 4294966272  ;;  %p2219_p6 = pmov %p2218_p1 }
  0x8c   : > { %p2220_p4 = pmov %p2218_p1 }
  0x8d   : > { %1700 = dma.done.wait (%p2219_p6), [#allocation12], 512  }
  0x8e   : > { %1702 = vsyncadd (%p2220_p4), [#allocation12], 4294966784  ;;  %v1743_v0 = vmov 0.0   ;;  %vm1744_vm0 = vmmov 0   ;;  %v642_v1 = vld [vmem:[#allocation8 + $0x18] sm:$0xff]  ;;  %v641_v2 = vld [vmem:[#allocation8 + $0x10] sm:$0xff] }
  0x8f   : > { %1273 = vmatprep.subr.mxu0 %v1743_v0  ;;  %1284 = vmatprep.subr.mxu1 %v1743_v0  ;;  %v729_v3 = vld [vmem:[#allocation10 + $0x18] sm:$0xff]  ;;  %v640_v4 = vld [vmem:[#allocation8 + $0x8] sm:$0xff]  ;;  %v728_v5 = vld [vmem:[#allocation10 + $0x10] sm:$0xff]  ;;  %vm650_vm1 = vcmask 261120   ;;  %s2025_s13 = sshll.u32 %s1725_s20, 7  ;;  %s614_s11 = scalar_lea.vmem [#allocation13], %s1984_s16 }
  0x90   : > { %1281 = vmatprep.mubr.msk.f32.mxu0 %vm1744_vm0, %v1743_v0  ;;  %1292 = vmatprep.mubr.msk.f32.mxu1 %vm1744_vm0, %v1743_v0  ;;  %v727_v6 = vld [vmem:[#allocation10 + $0x8] sm:$0xff]  ;;  %v639_v7 = vld [vmem:[#allocation8] sm:$0xff]  ;;  %v638_v8 = vld [vmem:[%s531_s17] sm:$0xff]  ;;  %s923_s22 = sshll.u32 %s614_s11, 4  ;;  %s621_s8 = scalar_lea.vmem [#allocation14], %s1984_s16  ;;  %s2040_s22 = int_to_ptr.vmem [resolvable:$true] %s923_s22 }
  0x91   : > { %1274 = vmatpush3.msra.mxu0 %v642_v1  ;;  %1285 = vmatpush3.msra.mxu1 %v729_v3  ;;  %v815_v9 = vld [vmem:[#allocation11 + $0x18] sm:$0xff]  ;;  %v726_v10 = vld [vmem:[#allocation10] sm:$0xff]  ;;  %v814_v12 = vld [vmem:[#allocation11 + $0x10] sm:$0xff]  ;;  %s938_s15 = sshll.u32 %s621_s8, 4  ;;  %s2038_s20 = scalar_lea.hbm %s2163_s9, %s2025_s13  ;;  %s2048_s15 = int_to_ptr.vmem [resolvable:$true] %s938_s15 }
  0x92   : > { %1275 = vmatprep.subr.mxu0 %v1743_v0  ;;  %1286 = vmatprep.subr.mxu1 %v1743_v0  ;;  %v725_v11 = vld [vmem:[%s540_s14] sm:$0xff]  ;;  %v811_v15 = vld [vmem:[%s549_s30] sm:$0xff]  ;;  %s2221_s17 = sld [smem:[#allocation33_spill]]  ;;  %s898_s30 = scalar_lea.sflag [#allocation4], %s1981_s29 }
  0x93   : > { %1276 = vmatpush3.msra.mxu0 %v641_v2  ;;  %1287 = vmatpush3.msra.mxu1 %v728_v5  ;;  %v813_v13 = vld [vmem:[#allocation11 + $0x8] sm:$0xff]  ;;  %v812_v14 = vld [vmem:[#allocation11] sm:$0xff]  ;;  %v1244_v16 = vld [vmem:[%s2158_s4] ss:$0 sm:$0xff]  ;;  %s1585_s25 = scalar_lea.vmem %s2040_s22, 128  ;;  %p2223_p12 = scmp.ne.s32.totalorder %s2203_s24, 0 }
  0x94   : > { %1277 = vmatprep.subr.mxu0 %v1743_v0  ;;  %1288 = vmatprep.subr.mxu1 %v1743_v0  ;;  %v1246_v18 = vld [vmem:[%s2160_s6] ss:$0 sm:$0xff]  ;;  %p1586_p8 = scmp.ne.s32.totalorder %s2040_s22, %s1585_s25  ;;  %s1745_s21 = smov [#allocation13]  }
  0x95   : > { %1278 = vmatpush3.msra.mxu0 %v640_v4  ;;  %1289 = vmatpush3.msra.mxu1 %v727_v6  ;;  %s1589_s28 = sshll.u32 %s1745_s21, 4  ;;  %s1590_s28 = int_to_ptr.vmem [resolvable:$false] %s1589_s28 }
  0x96   : > { %1279 = vmatprep.subr.mxu0 %v1743_v0  ;;  %1290 = vmatprep.subr.mxu1 %v1743_v0  ;;  %p1587_p3 = pnand %p1586_p8, %p2223_p12  ;;  %s1591_s3 = scalar_lea.vmem %s1590_s28, 256 }
  0x97   : > { %1280 = vmatpush3.msra.mxu0 %v639_v7  ;;  %1291 = vmatpush3.msra.mxu1 %v726_v10  ;;  %p1592_p0 = scmp.lt.s32.totalorder %s2040_s22, %s1590_s28  ;;  %p1593_p7 = scmp.lt.s32.totalorder %s1591_s3, %s1585_s25 }
  0x98   : > { %1282 = vmatmul.mubr.msk.f32.vlgmr.msra.gmra.mxu0 %vm650_vm1, %v638_v8  ;;  %1295 = vmatprep.subr.mxu0 %v1743_v0  ;;  %s2222_s27 = smov %s2221_s17  ;;  %s2046_s14 = scalar_lea.hbm %s2221_s17, %s2025_s13 }
  0x99   : > { %1296 = vmatpush3.msra.mxu0 %v815_v9  ;;  %1293 = vmatmul.mubr.msk.f32.vlgmr.msra.gmra.mxu1 %vm650_vm1, %v725_v11  ;;  %p1588_p9 = pneg %p1587_p3  ;;  %p1594_p10 = por %p1593_p7, %p1592_p0 }
  0x9a   : > { %1297 = vmatprep.subr.mxu0 %v1743_v0  ;;  %1303 = vmatprep.mubr.msk.f32.mxu0 %vm1744_vm0, %v1743_v0 }
  0x9b   : > { %1298 = vmatpush3.msra.mxu0 %v814_v12  ;;  %p1595_p13 = pnand %p1594_p10, %p1588_p9 }
  0x9c   : > { %1299 = vmatprep.subr.mxu0 %v1743_v0 }
  0x9d   : > { %1300 = vmatpush3.msra.mxu0 %v813_v13 }
  0x9e   : > { %1301 = vmatprep.subr.mxu0 %v1743_v0 }
  0x9f   : > { %1302 = vmatpush3.msra.mxu0 %v812_v14 }
  0xa0   : > { %1304 = vmatmul.mubr.msk.f32.vlgmr.msra.gmra.mxu0 %vm650_vm1, %v811_v15 }
 0x158   : > { %v720_v17 = vpop.f32.mrf.mxu0 }
 0x159   : > { %v721_v19 = vadd.f32 %v1244_v16, %v720_v17  ;;  %v806_v21 = vpop.f32.mrf.mxu1 }
 0x15a   : > { %v1283_v20 = vpop.f32.mrf.mxu0  ;;  %v807_v22 = vadd.f32 %v1246_v18, %v806_v21 }
 0x15b   : > { %724 = vst.msk [vmem:[%s614_s11] sm:$0xff] %vm650_vm1, %v721_v19  ;;  %v1294_v23 = vpop.f32.mrf.mxu1 }
 0x15c   : > { %1598 = shalt.err (!%p1595_p13)
}
 0x15d   : > { %s1599_s11 = scalar_lea.hbm %s2038_s20, 128  ;;  %s1603_s5 = scalar_lea.hbm %s2163_s9, 256 }
 0x15e   : > { %p1600_p5 = scmp.ne.s32.totalorder %s2038_s20, %s1599_s11  ;;  %p1604_p1 = scmp.lt.s32.totalorder %s2038_s20, %s2163_s9 }
 0x15f   : > { %p1605_p6 = scmp.lt.s32.totalorder %s1603_s5, %s1599_s11 }
 0x160   : > { %p1601_p11 = pnand %p1600_p5, %p2223_p12 }
 0x161   : > { %p1606_p4 = por %p1605_p6, %p1604_p1 }
 0x162   : > { %p1602_p2 = pneg %p1601_p11 }
 0x164   : > { %p1607_p8 = pnand %p1606_p4, %p1602_p2 }
 0x166   : > { %1610 = shalt.err (!%p1607_p8)
}
 0x167   : > { %1324 = dma.vmem_to_hbm [thread:$0]  (%p2223_p12), %s2040_s22, 128, %s2038_s20, %s898_s30   ;;  %810 = vst.msk [vmem:[%s621_s8] sm:$0xff] %vm650_vm1, %v807_v22 }
 0x168   : > { %s628_s17 = scalar_lea.vmem [#allocation16], %s1984_s16  ;;  %s2224_s3 = sld [smem:[#allocation32_spill]] }
 0x169   : > { %s2078_s25 = sshll.u32 %s628_s17, 4  ;;  %s2085_s11 = scalar_lea.sflag [#allocation15], %s536_s10  ;;  %s954_s25 = int_to_ptr.vmem [resolvable:$true] %s2078_s25 }
 0x16a   : > { %s1611_s29 = scalar_lea.vmem %s2048_s15, 128  ;;  %s1746_s22 = smov [#allocation14]  }
 0x16b   : > { %p1612_p3 = scmp.ne.s32.totalorder %s2048_s15, %s1611_s29  ;;  %s1615_s20 = sshll.u32 %s1746_s22, 4  ;;  %s1616_s20 = int_to_ptr.vmem [resolvable:$false] %s1615_s20 }
 0x16c   : > { %s1617_s8 = scalar_lea.vmem %s1616_s20, 256  ;;  %p1618_p7 = scmp.lt.s32.totalorder %s2048_s15, %s1616_s20 }
 0x16d   : > { %p1613_p9 = pnand %p1612_p3, %p2223_p12  ;;  %p1619_p10 = scmp.lt.s32.totalorder %s1617_s8, %s1611_s29 }
 0x16e   : > { %v1248_v24 = vld [vmem:[%s2224_s3] ss:$0 sm:$0xff] }
 0x16f   : > { %p1614_p0 = pneg %p1613_p9  ;;  %p1620_p13 = por %p1619_p10, %p1618_p7 }
 0x171   : > { %p1621_p5 = pnand %p1620_p13, %p1614_p0 }
 0x173   : > { %1624 = shalt.err (!%p1621_p5)
}
 0x174   : > { %s1625_s23 = scalar_lea.hbm %s2046_s14, 128  ;;  %s1629_s1 = scalar_lea.hbm %s2222_s27, 256 }
 0x175   : > { %p1626_p11 = scmp.ne.s32.totalorder %s2046_s14, %s1625_s23  ;;  %p1630_p6 = scmp.lt.s32.totalorder %s2046_s14, %s2222_s27 }
 0x176   : > { %p1631_p4 = scmp.lt.s32.totalorder %s1629_s1, %s1625_s23 }
 0x177   : > { %p1627_p2 = pnand %p1626_p11, %p2223_p12 }
 0x178   : > { %p1632_p8 = por %p1631_p4, %p1630_p6 }
 0x179   : > { %p1628_p1 = pneg %p1627_p2 }
 0x17b   : > { %p1633_p3 = pnand %p1632_p8, %p1628_p1 }
 0x17d   : > { %1636 = shalt.err (!%p1633_p3)
}
 0x17e   : > { %1325 = dma.vmem_to_hbm [thread:$0]  (%p2223_p12), %s2048_s15, 128, %s2046_s14, %s2085_s11   ;;  %v892_v25 = vpop.f32.mrf.mxu0 }
 0x17f   : > { %v893_v26 = vadd.f32 %v1248_v24, %v892_v25  ;;  %s2225_s28 = sld [smem:[#allocation34_spill]]  ;;  %s1637_s29 = scalar_lea.vmem %s954_s25, 128 }
 0x180   : > { %v1305_v27 = vpop.f32.mrf.mxu0  ;;  %p1638_p9 = scmp.ne.s32.totalorder %s954_s25, %s1637_s29  ;;  %s1747_s22 = smov [#allocation16]  }
 0x181   : > { %896 = vst.msk [vmem:[%s628_s17] sm:$0xff] %vm650_vm1, %v893_v26  ;;  %s1641_s20 = sshll.u32 %s1747_s22, 4  ;;  %s1642_s20 = int_to_ptr.vmem [resolvable:$false] %s1641_s20 }
 0x182   : > { %p1639_p0 = pnand %p1638_p9, %p2223_p12  ;;  %s1643_s15 = scalar_lea.vmem %s1642_s20, 256 }
 0x183   : > { %p1644_p10 = scmp.lt.s32.totalorder %s954_s25, %s1642_s20  ;;  %p1645_p13 = scmp.lt.s32.totalorder %s1643_s15, %s1637_s29 }
 0x184   : > { %p1640_p7 = pneg %p1639_p0 }
 0x185   : > { %s951_s3 = scalar_lea.hbm %s2225_s28, %s2025_s13  ;;  %p1646_p5 = por %p1645_p13, %p1644_p10 }
 0x187   : > { %p1647_p11 = pnand %p1646_p5, %p1640_p7 }
 0x189   : > { %1650 = shalt.err (!%p1647_p11)
}
 0x18a   : > { %s1651_s13 = scalar_lea.hbm %s951_s3, 128  ;;  %s1655_s17 = scalar_lea.hbm %s2225_s28, 256 }
 0x18b   : > { %p1652_p2 = scmp.ne.s32.totalorder %s951_s3, %s1651_s13  ;;  %p1656_p4 = scmp.lt.s32.totalorder %s951_s3, %s2225_s28 }
 0x18c   : > { %p1657_p8 = scmp.lt.s32.totalorder %s1655_s17, %s1651_s13 }
 0x18d   : > { %p1653_p1 = pnand %p1652_p2, %p2223_p12 }
 0x18e   : > { %p1658_p3 = por %p1657_p8, %p1656_p4 }
 0x18f   : > { %p1654_p6 = pneg %p1653_p1 }
 0x191   : > { %p1659_p9 = pnand %p1658_p3, %p1654_p6 }
 0x193   : > { %1662 = shalt.err (!%p1659_p9)
}
 0x194   : > { %1326 = dma.vmem_to_hbm [thread:$0]  (%p2223_p12), %s954_s25, 128, %s951_s3, %s2085_s11  }
 0x195 PF: > { %s2226_s10 = sld [smem:[#allocation23_spill]] }
 0x196   : > { %s2227_s30 = sld [smem:[#allocation26_spill]] }
 0x197   : > { %s2228_s1 = sld [smem:[#allocation25_spill]] }
 0x19b   : > { %s965_s5 = sand.u32 1, %s2226_s10  }
 0x19c   : > { %p2229_p0 = scmp.ne.s32.totalorder %s2227_s30, 0  ;;  %s966_s26 = scalar_lea.sflag [#allocation4], %s965_s5 }
 0x19d   : > { %p2230_p7 = scmp.ge.s32.totalorder %s2228_s1, 2 }
 0x19f   : > { %p1351_p10 = pnand %p2230_p7, %p2229_p0 }
 0x1a1   : > { %p1352_p13 = pneg %p1351_p10 }
 0x1a3   : > { %1704 = dma.done.wait (%p1352_p13), %s966_s26, 128  }
 0x1a4   : > { %1706 = vsyncadd (%p1352_p13), %s966_s26, 4294967168  ;;  %s2231_s12 = sadd.s32 4294967294, %s2228_s1  }
 0x1a5   : > { %s974_s21 = sand.u32 1, %s2231_s12  }
 0x1a6   : > { %s975_s29 = scalar_lea.sflag [#allocation15], %s974_s21 }
 0x1a7   : > { %1708 = dma.done.wait (%p1352_p13), %s975_s29, 256  }
 0x1a8   : > { %1710 = vsyncadd (%p1352_p13), %s975_s29, 4294967040  ;;  %s36_s22 = sadd.s32 1, %s2228_s1   ;;  %s2232_s24 = sld [smem:[#allocation28_spill]] }
 0x1a9   : > { %p33_p12 = scmp.ge.s32.totalorder %s36_s22, 4   ;;  %s2233_s20 = sld [smem:[#allocation24_spill]] }
 0x1aa   : > { %s2234_s21 = sld [smem:[#allocation27_spill]]  ;;  %s2235_s17 = smov %s1717_s18 }
 0x1ab   : > { %s2236_s18 = smov %s1721_s19  ;;  %35 = sbr.rel (!%p33_p12) target bundleno = 19 (0x13), region = 181 }
 0x1ae   : > { %s2237_s19 = smov %s2232_s24 }
 0x1b0   :  { %989 = vsyncpa [#allocation3], 1 }
 0x1b1   :  { %991 = vsyncpa [#allocation3 + $0x1], 1 }
 0x1b2   :  { %992 = vsyncpa [#allocation6], 1 }
 0x1b3   :  { %994 = vsyncpa [#allocation6 + $0x1], 1 }
 0x1b4   :  { %995 = vsyncpa [#allocation9], 1 }
 0x1b5   :  { %996 = vsyncpa [#allocation12], 1 }
 0x1b6   :  { %997 = vsyncpa [#allocation4], 1 }
 0x1b7   :  { %999 = vsyncpa [#allocation4 + $0x1], 1 }
 0x1b8   :  { %1000 = vsyncpa [#allocation15], 1 }
 0x1b9   :  { %1002 = vsyncpa [#allocation15 + $0x1], 1 }

</bundles_post_ra>
